<compile_context>
chip_gen: v7x
topology: tpu7x:2x2x1
jax: 0.10.0
libtpu: 0.0.40
codegen_flags: <defaults>
</compile_context>

<pallas_src>
import math

import jax
import jax.numpy as jnp
from jax.experimental import pallas as pl
from jax.experimental.pallas import tpu as pltpu


def _timestep_embedder_kernel(ts_ref, tab_ref, b2_ref, o_ref):
    bs = ts_ref.shape[0]
    d = tab_ref.shape[1]
    max_len = tab_ref.shape[0] - d          # packed table = [h_table ; w2]

    # ---- PE-row gather (already folded through Linear1) as a one-hot matmul.
    # One-hot values are exact in bf16; bf16 operands ride the MXU natively.
    ts = ts_ref[...]                                              # (bs, 1) i32
    lane_ids = jax.lax.broadcasted_iota(jnp.int32, (bs, max_len), 1)
    onehot = (lane_ids == ts).astype(jnp.bfloat16)                # (bs, max_len)
    h_tab = tab_ref[pl.ds(0, max_len), :]                         # (max_len, d) bf16
    h = jnp.dot(onehot, h_tab,
                preferred_element_type=jnp.float32)               # (bs, d) f32

    # ---- SiLU in f32 (VPU + EUP; v5e has no bf16 elementwise path) ---------
    h = h * jax.nn.sigmoid(h)

    # ---- Linear 2: bf16 operands, f32 accumulation, f32 bias ---------------
    w2 = tab_ref[pl.ds(max_len, d), :]                            # (d, d) bf16
    o = jnp.dot(h.astype(jnp.bfloat16), w2,
                preferred_element_type=jnp.float32) + b2_ref[...]

    # Output already in final (1, bs, d) layout, lane-dense last dim.
    o_ref[0] = o.astype(o_ref.dtype)


def prepare_timestep_embedder_params(pe, w1, b1, w2, b2):
    """One-time (per weight set) param prep.

    pe:     (max_len, 1, d) f32 sinusoidal table
    w1, w2: (d, d), stored as (in, out) = PyTorch W^T (any float dtype)
    b1, b2: (1, d) f32
    Returns (packed_tab bf16 (max_len+d, d), b2 f32 (1, d)).
    """
    max_len, _, d = pe.shape
    pe2d = pe.reshape(max_len, d).astype(jnp.float32)
    # Fold Linear1 through the constant PE table in full f32 precision.
    h_table = pe2d @ w1.astype(jnp.float32) + b1.astype(jnp.float32)
    packed = jnp.concatenate(
        [h_table.astype(jnp.bfloat16), w2.astype(jnp.bfloat16)], axis=0)
    return packed, b2.astype(jnp.float32)


def timestep_embedder_pallas(timesteps, packed_tab, b2):
    """Fused forward.

    timesteps:  (bs,) int32, each in [0, max_len)
    packed_tab: (max_len + d, d) bf16  -- [pe@W1+b1 ; W2], from prepare_*()
    b2:         (1, d) f32
    returns:    (1, bs, d) f32  -- matches time_embed(pe[timesteps]).permute(1,0,2)
    """
    n_rows, d = packed_tab.shape
    max_len = n_rows - d
    bs = timesteps.shape[0]
    ts2d = timesteps.reshape(bs, 1).astype(jnp.int32)

    flops = 2 * bs * max_len * d + 2 * bs * d * d
    transcendentals = bs * d
    bytes_accessed = (bs * 4                 # timesteps
                      + n_rows * d * 2       # packed bf16 table (h_table + w2)
                      + d * 4                # b2
                      + bs * d * 4)          # output

    return pl.pallas_call(
        _timestep_embedder_kernel,
        out_shape=jax.ShapeDtypeStruct((1, bs, d), jnp.float32),
        grid_spec=pltpu.PrefetchScalarGridSpec(
            num_scalar_prefetch=0,
            grid=(1,),
            in_specs=[
                pl.BlockSpec((bs, 1), lambda i: (0, 0)),       # timesteps (i32)
                pl.BlockSpec((n_rows, d), lambda i: (0, 0)),   # packed bf16 table
                pl.BlockSpec((1, d), lambda i: (0, 0)),        # b2 (f32)
            ],
            out_specs=pl.BlockSpec((1, bs, d), lambda i: (0, 0, 0)),
        ),
        compiler_params=pltpu.CompilerParams(
            dimension_semantics=("arbitrary",),
        ),
        cost_estimate=pl.CostEstimate(
            flops=flops,
            transcendentals=transcendentals,
            bytes_accessed=bytes_accessed,
        ),
    )(ts2d, packed_tab, b2)


def make_positional_encoding(max_len, d_model):
    """Standard MDM PositionalEncoding table, shape (max_len, 1, d_model)."""
    position = jnp.arange(0, max_len, dtype=jnp.float32)[:, None]          # (L, 1)
    div_term = jnp.exp(
        jnp.arange(0, d_model, 2, dtype=jnp.float32)
        * (-math.log(10000.0) / d_model)
    )                                                                       # (d/2,)
    angles = position * div_term                                            # (L, d/2)
    pe = jnp.zeros((max_len, d_model), dtype=jnp.float32)
    pe = pe.at[:, 0::2].set(jnp.sin(angles))
    pe = pe.at[:, 1::2].set(jnp.cos(angles))
    return pe[:, None, :]                                                   # (L, 1, d)


if __name__ == "__main__":
    latent_dim = 128   # d_model
    batch = 8
    max_len = 64

    key = jax.random.PRNGKey(0)
    k1, k2, k3, k4, k5 = jax.random.split(key, 5)

    # PyTorch Linear params (W (out,in), b (out,)) stored transposed as
    # (in, out) so the math is x @ W.  Weights in bf16, biases f32.
    scale = 1.0 / math.sqrt(latent_dim)
    w1 = jax.random.uniform(k1, (latent_dim, latent_dim), jnp.float32,
                            -scale, scale).astype(jnp.bfloat16)
    b1 = jax.random.uniform(k2, (1, latent_dim), jnp.float32, -scale, scale)
    w2 = jax.random.uniform(k3, (latent_dim, latent_dim), jnp.float32,
                            -scale, scale).astype(jnp.bfloat16)
    b2 = jax.random.uniform(k4, (1, latent_dim), jnp.float32, -scale, scale)

    pe = make_positional_encoding(max_len, latent_dim)
    timesteps = jax.random.randint(k5, (batch,), 0, max_len, dtype=jnp.int32)

    # One-time param prep (fold Linear1 into the PE table, pack weights).
    packed_tab, b2_prep = prepare_timestep_embedder_params(pe, w1, b1, w2, b2)

    out = timestep_embedder_pallas(timesteps, packed_tab, b2_prep)
    out = jax.block_until_ready(out)

    # Reference in plain JAX (same bf16 weight values, f32 math).
    x_ref = pe[timesteps].reshape(batch, latent_dim)
    h_ref = x_ref @ w1.astype(jnp.float32) + b1
    h_ref = h_ref * jax.nn.sigmoid(h_ref)
    y_ref = (h_ref @ w2.astype(jnp.float32) + b2).reshape(
        batch, 1, latent_dim).transpose(1, 0, 2)

    assert out.shape == (1, batch, latent_dim), out.shape
    # Accepted numeric contract: bf16 storage of (pe@W1+b1) and bf16 matmul
    # operands with f32 accumulation -> ~1e-3 level error vs the f32 reference.
    assert jnp.allclose(out, y_ref, atol=2e-2, rtol=2e-2), float(
        jnp.max(jnp.abs(out - y_ref)))

    print("KERNEL_OK")
</pallas_src>

<mosaic_0001>
module attributes {stable_mosaic.version = 11 : i64} {
  func.func @_timestep_embedder_kernel(%arg0: i32, %arg1: memref<8x1xi32, #tpu.memory_space<vmem>>, %arg2: memref<192x128xbf16, #tpu.memory_space<vmem>>, %arg3: memref<1x128xf32, #tpu.memory_space<vmem>>, %arg4: memref<1x8x128xf32, #tpu.memory_space<vmem>>) attributes {dimension_semantics = [#tpu.dimension_semantics<arbitrary>], iteration_bounds = array<i64: 1>, scalar_prefetch = 0 : i64, scratch_operands = 0 : i64, tpu.core_type = #tpu.core_type<tc>, window_params = [{pipeline_mode = #tpu.pipeline_mode<synchronous>, transform_indices = @transform_0, window_bounds = array<i64: 8, 1>}, {pipeline_mode = #tpu.pipeline_mode<synchronous>, transform_indices = @transform_1, window_bounds = array<i64: 192, 128>}, {pipeline_mode = #tpu.pipeline_mode<synchronous>, transform_indices = @transform_2, window_bounds = array<i64: 1, 128>}, {pipeline_mode = #tpu.pipeline_mode<synchronous>, transform_indices = @transform_3, window_bounds = array<i64: 1, 8, 128>}]} {
    %c0 = arith.constant 0 : index
    %c0_0 = arith.constant 0 : index
    %0 = vector.load %arg1[%c0, %c0_0] : memref<8x1xi32, #tpu.memory_space<vmem>>, vector<8x1xi32>
    %1 = tpu.iota {dimensions = array<i32: 1>} : vector<8x64xi32>
    %2 = vector.broadcast %0 : vector<8x1xi32> to vector<8x64xi32>
    %3 = arith.cmpi eq, %1, %2 : vector<8x64xi32>
    %4 = arith.extui %3 : vector<8x64xi1> to vector<8x64xi32>
    %5 = arith.sitofp %4 : vector<8x64xi32> to vector<8x64xf32>
    %6 = arith.truncf %5 : vector<8x64xf32> to vector<8x64xbf16>
    %c0_1 = arith.constant 0 : index
    %c0_2 = arith.constant 0 : index
    %7 = vector.load %arg2[%c0_1, %c0_2] : memref<192x128xbf16, #tpu.memory_space<vmem>>, vector<64x128xbf16>
    %cst = arith.constant dense<0.000000e+00> : vector<8x128xf32>
    %8 = tpu.matmul %6, %7, %cst {dimension_numbers = #tpu.dot_dimension_numbers<[1], [0], [0], [1], [0, 0, 1, 1], [], []>} : vector<8x64xbf16>, vector<64x128xbf16>, vector<8x128xf32> -> vector<8x128xf32>
    %9 = arith.negf %8 : vector<8x128xf32>
    %10 = math.exp %9 : vector<8x128xf32>
    %cst_3 = arith.constant 1.000000e+00 : f32
    %11 = vector.broadcast %cst_3 : f32 to vector<8x128xf32>
    %12 = arith.addf %11, %10 : vector<8x128xf32>
    %13 = arith.divf %11, %12 : vector<8x128xf32>
    %14 = arith.mulf %8, %13 : vector<8x128xf32>
    %c64 = arith.constant 64 : index
    %c0_4 = arith.constant 0 : index
    %15 = vector.load %arg2[%c64, %c0_4] : memref<192x128xbf16, #tpu.memory_space<vmem>>, vector<128x128xbf16>
    %16 = arith.truncf %14 : vector<8x128xf32> to vector<8x128xbf16>
    %cst_5 = arith.constant dense<0.000000e+00> : vector<8x128xf32>
    %17 = tpu.matmul %16, %15, %cst_5 {dimension_numbers = #tpu.dot_dimension_numbers<[1], [0], [0], [1], [0, 0, 1, 1], [], []>} : vector<8x128xbf16>, vector<128x128xbf16>, vector<8x128xf32> -> vector<8x128xf32>
    %c0_6 = arith.constant 0 : index
    %c0_7 = arith.constant 0 : index
    %18 = vector.load %arg3[%c0_6, %c0_7] : memref<1x128xf32, #tpu.memory_space<vmem>>, vector<1x128xf32>
    %19 = vector.broadcast %18 : vector<1x128xf32> to vector<8x128xf32>
    %20 = arith.addf %17, %19 : vector<8x128xf32>
    %c0_8 = arith.constant 0 : index
    %c0_9 = arith.constant 0 : index
    %c0_10 = arith.constant 0 : index
    %21 = vector.load %arg4[%c0_8, %c0_9, %c0_10] : memref<1x8x128xf32, #tpu.memory_space<vmem>>, vector<1x8x128xf32>
    %22 = vector.shape_cast %21 : vector<1x8x128xf32> to vector<8x128xf32>
    %23 = vector.shape_cast %20 : vector<8x128xf32> to vector<1x8x128xf32>
    tpu.vector_store %arg4[%c0_8, %c0_9, %c0_10], %23 {strides = array<i32>} : memref<1x8x128xf32, #tpu.memory_space<vmem>>, vector<1x8x128xf32>,
    return
  }
  func.func @transform_0(%arg0: i32) -> (i32, i32) {
    %c0_i32 = arith.constant 0 : i32
    %c0_i32_0 = arith.constant 0 : i32
    %c0_i32_1 = arith.constant 0 : i32
    return %c0_i32, %c0_i32_0 : i32, i32
  }
  func.func @transform_1(%arg0: i32) -> (i32, i32) {
    %c0_i32 = arith.constant 0 : i32
    %c0_i32_0 = arith.constant 0 : i32
    %c0_i32_1 = arith.constant 0 : i32
    return %c0_i32, %c0_i32_0 : i32, i32
  }
  func.func @transform_2(%arg0: i32) -> (i32, i32) {
    %c0_i32 = arith.constant 0 : i32
    %c0_i32_0 = arith.constant 0 : i32
    %c0_i32_1 = arith.constant 0 : i32
    return %c0_i32, %c0_i32_0 : i32, i32
  }
  func.func @transform_3(%arg0: i32) -> (i32, i32, i32) {
    %c0_i32 = arith.constant 0 : i32
    %c0_i32_0 = arith.constant 0 : i32
    %c0_i32_1 = arith.constant 0 : i32
    %c0_i32_2 = arith.constant 0 : i32
    return %c0_i32, %c0_i32_0, %c0_i32_1 : i32, i32, i32
  }
}

</mosaic_0001>

<bundles_post_ra>
// kernel: tpu_custom_call.1
= control target key start
LH: loop header
LB: loop body
LE: loop exit
PB: predicated region body
PF: predicated region fallthrough
CT: control target
= control target key end

     0   :  { %8 = vsyncpa [#allocation3], 0  ;;  %s442_s0 = inlined_call_operand.vmem [shape: s32[8,1], index: 0, kind: input, shape index: {}]   ;;  %s443_s1 = inlined_call_operand.hbm [shape: bf16[192,128], index: 1, kind: input, shape index: {}]   ;;  %s444_s2 = inlined_call_operand.vmem [shape: f32[1,128], index: 2, kind: input, shape index: {}]   ;;  %s445_s3 = inlined_call_operand.hbm [shape: f32[1,8,128], index: 3, kind: output, shape index: {}]  }
   0x1   :  { %9 = vsyncpa [#allocation4], 0  ;;  %s385_s12 = smov [#allocation2]   ;;  %s337_s16 = scalar_lea.hbm %s443_s1, 1536 }
   0x2   :  { %s17_s13 = sshll.u32 %s385_s12, 4  ;;  %p338_p0 = scmp.ne.s32.totalorder %s443_s1, %s337_s16  ;;  %s18_s13 = int_to_ptr.vmem [resolvable:$true] %s17_s13 }
   0x3   :  { %p341_p1 = scmp.lt.u32.totalorder %s337_s16, %s443_s1 }
   0x5   :  { %p343_p2 = pnand %p341_p1, %p338_p0 }
   0x7   :  { %346 = shalt.err (!%p343_p2)
}
   0x8   :  { %s347_s21 = scalar_lea.vmem %s18_s13, 1536  ;;  %p352_p4 = scmp.lt.s32.totalorder %s18_s13, %s18_s13 }
   0x9   :  { %p348_p3 = scmp.ne.s32.totalorder %s18_s13, %s347_s21  ;;  %p353_p5 = scmp.lt.s32.totalorder %s347_s21, %s347_s21 }
   0xb   :  { %p354_p6 = por %p353_p5, %p352_p4 }
   0xd   :  { %p355_p7 = pnand %p354_p6, %p348_p3 }
   0xf   :  { %358 = shalt.err (!%p355_p7)
}
  0x10   :  { %s386_s22 = smov 64   ;;  %s387_s23 = smov 4  }
  0x11   :  { %23 = dma.hbm_to_vmem [thread:$0]  %s443_s1, 1536, %s18_s13, [#allocation3], %s386_s22, %s386_s22, %s387_s23  }
  0x12   :  { %381 = dma.done.wait [#allocation3], 1536  }
  0x13   :  { %382 = vsyncadd [#allocation3], 4294965760  ;;  %v388_v0 = vmov 0   ;;  %v389_v1 = vmov 0.0   ;;  %v30_v2 = vld [vmem:[%s442_s0] sm:$0xff]  ;;  %v321_v3 = vld [vmem:[#allocation2] sm:$0xff]   ;;  %v31_v7 = vlaneseq }
  0x14   :  { %320 = vset.pattern.permute.xlu0 %v388_v0  ;;  %281 = vmatprep.subr.bf16.mxu0 %v389_v1  ;;  %v322_v4 = vld [vmem:[#allocation2 + $0x8] sm:$0xff]   ;;  %vm390_vm0 = vmmov 0   ;;  %v323_v5 = vld [vmem:[#allocation2 + $0x10] sm:$0xff]   ;;  %v324_v6 = vld [vmem:[#allocation2 + $0x18] sm:$0xff]   ;;  %vm72_vm2 = vcmask 523264   ;;  %s391_s28 = smov [#allocation5]  }
  0x15   :  { %293 = vmatprep.subr.bf16.mxu1 %v389_v1  ;;  %34 = vperm.xlu0 %320, %v30_v2   ;;  %v32_v8 = vand.u32 127, %v31_v7  ;;  %v325_v12 = vld [vmem:[#allocation2 + $0x20] sm:$0xff]   ;;  %v326_v13 = vld [vmem:[#allocation2 + $0x28] sm:$0xff]   ;;  %v327_v14 = vld [vmem:[#allocation2 + $0x30] sm:$0xff]   ;;  %s242_s29 = sshll.u32 %s391_s28, 4  ;;  %s243_s29 = int_to_ptr.vmem [resolvable:$true] %s242_s29 }
  0x16   :  { %282 = vmatpush3.bf16.msra.mxu0 %v321_v3  ;;  %289 = vmatprep.mubr.msk.bf16.mxu0 %vm390_vm0, %v389_v1  ;;  %v328_v15 = vld [vmem:[#allocation2 + $0x38] sm:$0xff]   ;;  %v329_v16 = vld [vmem:[#allocation2 + $0x40] sm:$0xff]   ;;  %v330_v17 = vld [vmem:[#allocation2 + $0x48] sm:$0xff]   ;;  %s359_s30 = scalar_lea.vmem %s243_s29, 128  ;;  %p364_p9 = scmp.lt.s32.totalorder %s243_s29, %s243_s29 }
  0x17   :  { %283 = vmatprep.subr.bf16.mxu0 %v389_v1  ;;  %309 = vmatprep.mubr.msk.bf16.mxu1 %vm390_vm0, %v389_v1  ;;  %v331_v18 = vld [vmem:[#allocation2 + $0x50] sm:$0xff]   ;;  %v332_v19 = vld [vmem:[#allocation2 + $0x58] sm:$0xff]   ;;  %p360_p8 = scmp.ne.s32.totalorder %s243_s29, %s359_s30  ;;  %p365_p10 = scmp.lt.s32.totalorder %s359_s30, %s359_s30 }
  0x18   :  { %294 = vmatpush3.bf16.msra.mxu1 %v325_v12  ;;  %v258_v30 = vld [vmem:[%s444_s2] ss:$0 sm:$0xff] }
  0x19   :  { %295 = vmatprep.subr.bf16.mxu1 %v389_v1  ;;  %p366_p11 = por %p365_p10, %p364_p9 }
  0x1a   :  { %284 = vmatpush3.bf16.msra.mxu0 %v322_v4 }
  0x1b   :  { %285 = vmatprep.subr.bf16.mxu0 %v389_v1  ;;  %p367_p12 = pnand %p366_p11, %p360_p8 }
  0x1c   :  { %296 = vmatpush3.bf16.msra.mxu1 %v326_v13 }
  0x1d   :  { %297 = vmatprep.subr.bf16.mxu1 %v389_v1 }
  0x1e   :  { %286 = vmatpush3.bf16.msra.mxu0 %v323_v5 }
  0x1f   :  { %287 = vmatprep.subr.bf16.mxu0 %v389_v1 }
  0x20   :  { %298 = vmatpush3.bf16.msra.mxu1 %v327_v14 }
  0x21   :  { %299 = vmatprep.subr.bf16.mxu1 %v389_v1 }
  0x22   :  { %288 = vmatpush3.bf16.msra.mxu0 %v324_v6 }
  0x24   :  { %300 = vmatpush3.bf16.msra.mxu1 %v328_v15 }
  0x25   :  { %301 = vmatprep.subr.bf16.mxu1 %v389_v1 }
  0x28   :  { %302 = vmatpush3.bf16.msra.mxu1 %v329_v16 }
  0x29   :  { %303 = vmatprep.subr.bf16.mxu1 %v389_v1 }
  0x2c   :  { %304 = vmatpush3.bf16.msra.mxu1 %v330_v17 }
  0x2d   :  { %305 = vmatprep.subr.bf16.mxu1 %v389_v1 }
  0x30   :  { %306 = vmatpush3.bf16.msra.mxu1 %v331_v18 }
  0x31   :  { %307 = vmatprep.subr.bf16.mxu1 %v389_v1 }
  0x34   :  { %308 = vmatpush3.bf16.msra.mxu1 %v332_v19 }
  0x94   :  { %v35_v9 = vpop.permute.xlu0 %34 }
  0x95   :  { %vm36_vm1 = vcmp.eq.s32.totalorder %v32_v8, %v35_v9 }
  0x96   :  { %v251_v10 = vsel %vm36_vm1, 1.0, %v389_v1 }
  0x97   :  { %v39_v11 = vpack.c.bf16 %v251_v10, %v251_v10 }
  0x99   :  { %290 = vmatmul.mubr.msk.bf16.vlgmr.msra.gmra.mrb[0].mxu0 %vm72_vm2, %v39_v11 }
 0x16c   :  { %v110_v20 = vpop.f32.mrb[0].mxu0 }
 0x16d   :  { %v257_v21 = vmul.f32 -1.442695, %v110_v20  ;;  %v291_v22 = vpop.f32.mrb[1].mxu0 }
 0x16e   :  { %v113_v23 = vpop.f32.mrb[2].mxu0 }
 0x16f   :  { %333 = vpow2.f32 %v257_v21  ;;  %v292_v24 = vpop.f32.mrb[3].mxu0 }
 0x179   :  { %v334_v25 = vpop.eup %333 }
 0x17a   :  { %v119_v26 = vadd.f32 1.0, %v334_v25 }
 0x17c   :  { %335 = vrcp.f32 %v119_v26 }
 0x186   :  { %v336_v27 = vpop.eup %335 }
 0x187   :  { %v122_v28 = vmul.f32 %v336_v27, %v110_v20 }
 0x189   :  { %v139_v29 = vpack.c.bf16 %v122_v28, %v122_v28 }
 0x18b   :  { %310 = vmatmul.mubr.bf16.vlgmr.msra.gmra.mrb[0].mxu1 %v139_v29 }
 0x25e   :  { %v229_v31 = vpop.f32.mrb[0].mxu1 }
 0x25f   :  { %v230_v32 = vadd.f32 %v258_v30, %v229_v31  ;;  %v311_v33 = vpop.f32.mrb[1].mxu1 }
 0x260   :  { %v232_v34 = vpop.f32.mrb[2].mxu1 }
 0x261   :  { %235 = vst [vmem:[#allocation5] sm:$0xff] %v230_v32  ;;  %v312_v35 = vpop.f32.mrb[3].mxu1 }
 0x262   :  { %370 = shalt.err (!%p367_p12)
}
 0x263   :  { %s371_s2 = scalar_lea.hbm %s445_s3, 128 }
 0x264   :  { %p372_p13 = scmp.ne.s32.totalorder %s445_s3, %s371_s2  ;;  %p375_p0 = scmp.lt.u32.totalorder %s371_s2, %s445_s3 }
 0x266   :  { %p377_p1 = pnand %p375_p0, %p372_p13 }
 0x268   :  { %380 = shalt.err (!%p377_p1)
}
 0x269   :  { %245 = dma.vmem_to_hbm [thread:$0]  %s243_s29, 128, %s445_s3, [#allocation4]  }
 0x26a   :  { %383 = dma.done.wait [#allocation4], 128  }
 0x26b   :  { %384 = vsyncadd [#allocation4], 4294967168 }
 0x26c   :  { %249 = vsyncpa [#allocation3], 1 }
 0x26d   :  { %250 = vsyncpa [#allocation4], 1 }

</bundles_post_ra>
